<compile_context>
chip_gen: v7x
topology: tpu7x:2x2x1
jax: 0.10.0
libtpu: 0.0.40
codegen_flags: <defaults>
</compile_context>

<pallas_src>
import math
import numpy as np
import jax
import jax.numpy as jnp
from jax import lax
from jax.experimental import pallas as pl
from jax.experimental.pallas import tpu as pltpu

F32 = jnp.float32


def _round_up(v, m):
    return ((v + m - 1) // m) * m


def _split_dim(size, align, max_tile):
    """Pick (tile, padded_size, n_blocks): tile is a multiple of `align`,
    blocks are balanced so rounding waste is at most `align`-1 per block."""
    aligned = _round_up(max(size, 1), align)
    max_tile = max(max_tile, align)
    nblk = -(-aligned // max_tile)                       # ceil div
    tile = _round_up(-(-aligned // nblk), align)
    return tile, tile * nblk, nblk


def _vmem_limit_bytes(tm, tn, tk, op_bytes):
    """Budget for double-buffered x/w/bias tiles + resident/double-buffered
    f32 output tile, clamped to this generation's physical VMEM."""
    need = 2 * (tm * tk + tn * tk) * op_bytes + 2 * tn * 4 + 2 * tm * tn * 4
    need = int(need * 1.5) + (4 << 20)
    try:
        info = pltpu.get_tpu_info()
        phys = int(getattr(info, "vmem_capacity_bytes", 0)) or (64 << 20)
    except Exception:  # pragma: no cover - conservative fallback
        phys = 64 << 20                                   # v7x-safe default
    return int(max(32 << 20, min(need, int(phys * 0.75))))


def _dot_nt(x, w):
    # x: (tm, tk), w: (tn, tk) in PyTorch (out, in) layout -> (tm, tn), f32 acc.
    return lax.dot_general(
        x, w,
        dimension_numbers=(((1,), (1,)), ((), ())),
        preferred_element_type=jnp.float32)


def _linear_kernel_acc_out(x_ref, w_ref, b_ref, o_ref):
    """f32 output: accumulate directly into the VMEM-resident output tile."""
    k = pl.program_id(2)

    @pl.when(k == 0)
    def _():
        o_ref[...] = jnp.zeros_like(o_ref)

    o_ref[...] += _dot_nt(x_ref[...], w_ref[...])

    @pl.when(k == pl.num_programs(2) - 1)
    def _():
        o_ref[...] += b_ref[...]


def _linear_kernel_scratch(x_ref, w_ref, b_ref, o_ref, acc_ref):
    """Non-f32 output: keep an f32 scratch accumulator, cast once at the end."""
    k = pl.program_id(2)

    @pl.when(k == 0)
    def _():
        acc_ref[...] = jnp.zeros_like(acc_ref)

    acc_ref[...] += _dot_nt(x_ref[...], w_ref[...])

    @pl.when(k == pl.num_programs(2) - 1)
    def _():
        o_ref[...] = (acc_ref[...] + b_ref[...]).astype(o_ref.dtype)


def _linear_small_kernel(x_ref, w_ref, b_ref, o_ref):
    """Single fused block: one matmul + bias, no K pipeline."""
    o_ref[...] = (_dot_nt(x_ref[...], w_ref[...]) + b_ref[...]).astype(o_ref.dtype)


def linear_norm_forward(x, weight, bias=None, *, tm=512, tn=512, tk=2048,
                        operand_dtype=jnp.bfloat16,
                        small_path_bytes=2 << 20, path="auto"):
    """y = x @ weight.T + bias  (PyTorch nn.Linear / LinearNorm semantics).

    x:      (..., in_dim)
    weight: (out_dim, in_dim)   -- PyTorch layout, consumed without transpose
    bias:   (out_dim,) or None
    operand_dtype: dtype the MXU operands are cast to (bf16 default; pass
                   jnp.float32 to keep a full-precision matmul path).
    """
    lead = x.shape[:-1]
    K = x.shape[-1]
    N = weight.shape[0]
    M = int(np.prod(lead)) if lead else 1
    out_dtype = x.dtype if jnp.issubdtype(x.dtype, jnp.floating) else F32

    total_bytes = (M * K * jnp.dtype(x.dtype).itemsize
                   + N * K * jnp.dtype(weight.dtype).itemsize
                   + M * N * 4 + N * 4)

    # ---------------- small-problem fast path -------------------------------
    # Tiny Linears are launch-overhead bound: run one fused VMEM block with a
    # single grid step (no K-axis pipeline) and keep input precision.  Minimal
    # (8, 128) alignment padding is kept for robust Mosaic lowering.
    if path == "small" or (path == "auto" and total_bytes <= small_path_bytes):
        cd = jnp.promote_types(x.dtype, weight.dtype)
        cd = cd if jnp.issubdtype(cd, jnp.floating) else F32
        m_align = 8 if jnp.dtype(cd).itemsize >= 4 else 16
        Mp, Kp, Np = _round_up(M, m_align), _round_up(K, 128), _round_up(N, 128)

        x2 = jnp.pad(x.reshape(M, K).astype(cd), ((0, Mp - M), (0, Kp - K)))
        w2 = jnp.pad(weight.astype(cd), ((0, Np - N), (0, Kp - K)))
        b2 = (bias if bias is not None else jnp.zeros((N,), F32)).astype(F32)
        b2 = jnp.pad(b2, (0, Np - N)).reshape(1, Np)

        out_p = pl.pallas_call(
            _linear_small_kernel,
            out_shape=jax.ShapeDtypeStruct((Mp, Np), out_dtype),
            grid_spec=pltpu.PrefetchScalarGridSpec(
                num_scalar_prefetch=0,
                grid=(1,),
                in_specs=[
                    pl.BlockSpec((Mp, Kp), lambda i: (0, 0)),
                    pl.BlockSpec((Np, Kp), lambda i: (0, 0)),
                    pl.BlockSpec((1, Np), lambda i: (0, 0)),
                ],
                out_specs=pl.BlockSpec((Mp, Np), lambda i: (0, 0)),
            ),
        )(x2, w2, b2)
        return out_p[:M, :N].reshape(*lead, N)

    # ---------------- tiled, pipelined path ----------------------------------
    op_dt = jnp.dtype(operand_dtype)
    op_bytes = op_dt.itemsize
    m_align = 8 if op_bytes >= 4 else (16 if op_bytes == 2 else 32)

    # Operands for the MXU (bf16 by default, f32 accumulation in the kernel).
    # Weight stays in PyTorch (N, K) layout -> no transpose HBM pass; passing
    # weights already stored in `operand_dtype` avoids the cast pass entirely.
    x2 = x.reshape(M, K).astype(op_dt)
    w2 = weight.astype(op_dt)
    b2 = (bias if bias is not None else jnp.zeros((N,), F32)).astype(F32)

    # Balanced tiles: biggest tile <= default, aligned, minimal rounding waste.
    tm, Mp, nm = _split_dim(M, m_align, tm)
    tn, Np, nn = _split_dim(N, 128, tn)
    tk, Kp, nk = _split_dim(K, 128, tk)

    # Megacore (v7x has 2 TensorCores sharded over the "parallel" axes): when
    # M fits in one tile, split N so the parallel sub-grid has >=2 blocks.
    if nm * nn < 2 and Np >= 256:
        tn, Np, nn = _split_dim(N, 128, _round_up(Np // 2, 128))

    # Zero padding is contraction-safe on K; padded M rows / N cols sliced off.
    x_p = x2 if (Mp == M and Kp == K) else jnp.pad(x2, ((0, Mp - M), (0, Kp - K)))
    w_p = w2 if (Np == N and Kp == K) else jnp.pad(w2, ((0, Np - N), (0, Kp - K)))
    b_p = (b2 if Np == N else jnp.pad(b2, (0, Np - N))).reshape(1, Np)

    grid = (Mp // tm, Np // tn, Kp // tk)

    # f32 outputs accumulate directly into the output tile (it stays VMEM
    # resident across the K axis); other output dtypes use an f32 scratch.
    acc_in_out = jnp.dtype(out_dtype) == jnp.dtype(F32)
    kernel = _linear_kernel_acc_out if acc_in_out else _linear_kernel_scratch
    scratch = [] if acc_in_out else [pltpu.VMEM((tm, tn), F32)]

    out_p = pl.pallas_call(
        kernel,
        out_shape=jax.ShapeDtypeStruct((Mp, Np), out_dtype),
        grid_spec=pltpu.PrefetchScalarGridSpec(
            num_scalar_prefetch=0,
            grid=grid,
            in_specs=[
                pl.BlockSpec((tm, tk), lambda i, j, k: (i, k)),   # activations
                pl.BlockSpec((tn, tk), lambda i, j, k: (j, k)),   # weight (N,K)
                pl.BlockSpec((1, tn), lambda i, j, k: (0, j)),    # bias row
            ],
            out_specs=pl.BlockSpec((tm, tn), lambda i, j, k: (i, j)),
            scratch_shapes=scratch,
        ),
        compiler_params=pltpu.CompilerParams(
            dimension_semantics=("parallel", "parallel", "arbitrary"),
            vmem_limit_bytes=_vmem_limit_bytes(tm, tn, tk, op_bytes),
        ),
    )(x_p, w_p, b_p)

    return out_p[:M, :N].reshape(*lead, N)


def build_linear_norm_params(key, in_dim, out_dim, *, bias=True,
                             w_init_gain="linear", dtype=F32):
    """Mirrors LinearNorm.__init__: xavier_uniform_(weight, gain) + default bias."""
    gains = {"linear": 1.0, "relu": math.sqrt(2.0), "tanh": 5.0 / 3.0,
             "sigmoid": 1.0}
    gain = gains.get(w_init_gain, 1.0)
    kw, kb = jax.random.split(key, 2)
    a = gain * math.sqrt(6.0 / (in_dim + out_dim))            # xavier_uniform_
    weight = jax.random.uniform(kw, (out_dim, in_dim), dtype, minval=-a, maxval=a)
    if bias:
        bb = 1.0 / math.sqrt(in_dim)                          # nn.Linear default
        b = jax.random.uniform(kb, (out_dim,), dtype, minval=-bb, maxval=bb)
    else:
        b = None
    return {"weight": weight, "bias": b}


if __name__ == "__main__":
    key = jax.random.PRNGKey(0)
    k1, k2, k3, k4 = jax.random.split(key, 4)

    # --- 1) small-problem fast path (single fused block, full precision) ----
    B, T, in_dim, out_dim = 2, 16, 32, 64
    x_small = jax.random.normal(k1, (B, T, in_dim), dtype=F32)
    p_small = build_linear_norm_params(k2, in_dim, out_dim,
                                       bias=True, w_init_gain="linear")
    y_small = jax.block_until_ready(
        linear_norm_forward(x_small, p_small["weight"], p_small["bias"]))
    ref_small = (jnp.einsum("btk,nk->btn", x_small, p_small["weight"])
                 + p_small["bias"])
    assert y_small.shape == (B, T, out_dim), y_small.shape
    assert bool(jnp.all(jnp.isfinite(y_small)))
    assert bool(jnp.allclose(y_small, ref_small, atol=1e-4, rtol=1e-4))

    # --- 2) tiled bf16-operand path (unaligned shapes exercise padding) -----
    B2, T2, in2, out2 = 2, 136, 160, 200
    x_big = jax.random.normal(k3, (B2, T2, in2), dtype=F32)
    p_big = build_linear_norm_params(k4, in2, out2,
                                     bias=True, w_init_gain="relu")
    y_big = jax.block_until_ready(
        linear_norm_forward(x_big, p_big["weight"], p_big["bias"],
                            path="tiled"))
    ref_big = jnp.einsum("btk,nk->btn", x_big, p_big["weight"]) + p_big["bias"]
    assert y_big.shape == (B2, T2, out2), y_big.shape
    assert bool(jnp.all(jnp.isfinite(y_big)))
    rel_err = jnp.max(jnp.abs(y_big - ref_big)) / (jnp.max(jnp.abs(ref_big)) + 1e-6)
    assert bool(rel_err < 3e-2), float(rel_err)   # bf16-operand tolerance

    print("KERNEL_OK")
</pallas_src>

<mosaic_0001>
module attributes {stable_mosaic.version = 11 : i64} {
  func.func @_linear_small_kernel(%arg0: i32, %arg1: memref<32x128xf32, #tpu.memory_space<vmem>>, %arg2: memref<128x128xf32, #tpu.memory_space<vmem>>, %arg3: memref<1x128xf32, #tpu.memory_space<vmem>>, %arg4: memref<32x128xf32, #tpu.memory_space<vmem>>) attributes {dimension_semantics = [#tpu.dimension_semantics<arbitrary>], iteration_bounds = array<i64: 1>, scalar_prefetch = 0 : i64, scratch_operands = 0 : i64, tpu.core_type = #tpu.core_type<tc>, window_params = [{pipeline_mode = #tpu.pipeline_mode<synchronous>, transform_indices = @transform_0, window_bounds = array<i64: 32, 128>}, {pipeline_mode = #tpu.pipeline_mode<synchronous>, transform_indices = @transform_1, window_bounds = array<i64: 128, 128>}, {pipeline_mode = #tpu.pipeline_mode<synchronous>, transform_indices = @transform_2, window_bounds = array<i64: 1, 128>}, {pipeline_mode = #tpu.pipeline_mode<synchronous>, transform_indices = @transform_3, window_bounds = array<i64: 32, 128>}]} {
    %c0 = arith.constant 0 : index
    %c0_0 = arith.constant 0 : index
    %0 = vector.load %arg1[%c0, %c0_0] : memref<32x128xf32, #tpu.memory_space<vmem>>, vector<32x128xf32>
    %c0_1 = arith.constant 0 : index
    %c0_2 = arith.constant 0 : index
    %1 = vector.load %arg2[%c0_1, %c0_2] : memref<128x128xf32, #tpu.memory_space<vmem>>, vector<128x128xf32>
    %cst = arith.constant dense<0.000000e+00> : vector<32x128xf32>
    %2 = tpu.matmul %0, %1, %cst {dimension_numbers = #tpu.dot_dimension_numbers<[1], [1], [0], [0], [0, 0, 1, 0], [], []>} : vector<32x128xf32>, vector<128x128xf32>, vector<32x128xf32> -> vector<32x128xf32>
    %c0_3 = arith.constant 0 : index
    %c0_4 = arith.constant 0 : index
    %3 = vector.load %arg3[%c0_3, %c0_4] : memref<1x128xf32, #tpu.memory_space<vmem>>, vector<1x128xf32>
    %4 = vector.broadcast %3 : vector<1x128xf32> to vector<32x128xf32>
    %5 = arith.addf %2, %4 : vector<32x128xf32>
    %c0_5 = arith.constant 0 : index
    %c0_6 = arith.constant 0 : index
    %6 = vector.load %arg4[%c0_5, %c0_6] : memref<32x128xf32, #tpu.memory_space<vmem>>, vector<32x128xf32>
    tpu.vector_store %arg4[%c0_5, %c0_6], %5 {strides = array<i32>} : memref<32x128xf32, #tpu.memory_space<vmem>>, vector<32x128xf32>,
    return
  }
  func.func @transform_0(%arg0: i32) -> (i32, i32) {
    %c0_i32 = arith.constant 0 : i32
    %c0_i32_0 = arith.constant 0 : i32
    %c0_i32_1 = arith.constant 0 : i32
    return %c0_i32, %c0_i32_0 : i32, i32
  }
  func.func @transform_1(%arg0: i32) -> (i32, i32) {
    %c0_i32 = arith.constant 0 : i32
    %c0_i32_0 = arith.constant 0 : i32
    %c0_i32_1 = arith.constant 0 : i32
    return %c0_i32, %c0_i32_0 : i32, i32
  }
  func.func @transform_2(%arg0: i32) -> (i32, i32) {
    %c0_i32 = arith.constant 0 : i32
    %c0_i32_0 = arith.constant 0 : i32
    %c0_i32_1 = arith.constant 0 : i32
    return %c0_i32, %c0_i32_0 : i32, i32
  }
  func.func @transform_3(%arg0: i32) -> (i32, i32) {
    %c0_i32 = arith.constant 0 : i32
    %c0_i32_0 = arith.constant 0 : i32
    %c0_i32_1 = arith.constant 0 : i32
    return %c0_i32, %c0_i32_0 : i32, i32
  }
}

</mosaic_0001>

<bundles_post_ra>
// kernel: tpu_custom_call.1
= control target key start
LH: loop header
LB: loop body
LE: loop exit
PB: predicated region body
PF: predicated region fallthrough
CT: control target
= control target key end

     0   :  { %8 = vsyncpa [#allocation3], 0  ;;  %s434_s0 = inlined_call_operand.hbm [shape: f32[32,128], index: 0, kind: input, shape index: {}]   ;;  %s435_s1 = inlined_call_operand.hbm [shape: f32[128,128], index: 1, kind: input, shape index: {}]   ;;  %s436_s2 = inlined_call_operand.vmem [shape: f32[1,128], index: 2, kind: input, shape index: {}]   ;;  %s437_s3 = inlined_call_operand.hbm [shape: f32[32,128], index: 3, kind: output, shape index: {}]  }
   0x1   :  { %9 = vsyncpa [#allocation6], 0 }
   0x2   :  { %10 = vsyncpa [#allocation4], 0  ;;  %s361_s12 = smov [#allocation2]   ;;  %s289_s16 = scalar_lea.hbm %s434_s0, 512 }
   0x3   :  { %s16_s13 = sshll.u32 %s361_s12, 4  ;;  %p290_p0 = scmp.ne.s32.totalorder %s434_s0, %s289_s16  ;;  %s17_s13 = int_to_ptr.vmem [resolvable:$true] %s16_s13 }
   0x4   :  { %p293_p1 = scmp.lt.u32.totalorder %s289_s16, %s434_s0 }
   0x6   :  { %p295_p2 = pnand %p293_p1, %p290_p0 }
   0x8   :  { %298 = shalt.err (!%p295_p2)
}
   0x9   :  { %s299_s21 = scalar_lea.vmem %s17_s13, 512  ;;  %p304_p4 = scmp.lt.s32.totalorder %s17_s13, %s17_s13 }
   0xa   :  { %p300_p3 = scmp.ne.s32.totalorder %s17_s13, %s299_s21  ;;  %p305_p5 = scmp.lt.s32.totalorder %s299_s21, %s299_s21 }
   0xc   :  { %p306_p6 = por %p305_p5, %p304_p4 }
   0xe   :  { %p307_p7 = pnand %p306_p6, %p300_p3 }
  0x10   :  { %310 = shalt.err (!%p307_p7)
}
  0x11   :  { %s362_s22 = smov 128   ;;  %s363_s23 = smov 8  }
  0x12   :  { %22 = dma.hbm_to_vmem [thread:$0]  %s434_s0, 512, %s17_s13, [#allocation3], %s362_s22, %s362_s22, %s363_s23  }
  0x13   :  { %s364_s26 = smov [#allocation5]   ;;  %s311_s30 = scalar_lea.hbm %s435_s1, 2048 }
  0x14   :  { %s28_s27 = sshll.u32 %s364_s26, 4  ;;  %p312_p8 = scmp.ne.s32.totalorder %s435_s1, %s311_s30  ;;  %s29_s27 = int_to_ptr.vmem [resolvable:$true] %s28_s27 }
  0x15   :  { %p315_p9 = scmp.lt.u32.totalorder %s311_s30, %s435_s1 }
  0x17   :  { %p317_p10 = pnand %p315_p9, %p312_p8 }
  0x19   :  { %320 = shalt.err (!%p317_p10)
}
  0x1a   :  { %s321_s8 = scalar_lea.vmem %s29_s27, 2048  ;;  %p326_p12 = scmp.lt.s32.totalorder %s29_s27, %s29_s27 }
  0x1b   :  { %p322_p11 = scmp.ne.s32.totalorder %s29_s27, %s321_s8  ;;  %p327_p13 = scmp.lt.s32.totalorder %s321_s8, %s321_s8 }
  0x1d   :  { %p328_p0 = por %p327_p13, %p326_p12 }
  0x1f   :  { %p329_p1 = pnand %p328_p0, %p322_p11 }
  0x21   :  { %332 = shalt.err (!%p329_p1)
}
  0x22   :  { %34 = dma.hbm_to_vmem [thread:$0]  %s435_s1, 2048, %s29_s27, [#allocation6], %s362_s22, %s362_s22, %s363_s23  }
  0x23   :  { %355 = dma.done.wait [#allocation3], 512  }
  0x24   :  { %356 = vsyncadd [#allocation3], 4294966784 }
  0x25   :  { %357 = dma.done.wait [#allocation6], 2048  }
  0x26   :  { %358 = vsyncadd [#allocation6], 4294965248  ;;  %v47_v0 = vld [vmem:[#allocation5] sm:$0xff]  ;;  %v48_v1 = vld [vmem:[#allocation5 + $0x8] sm:$0xff]  ;;  %s365_s11 = smov [#allocation7]  }
  0x27   :  { %v49_v2 = vld [vmem:[#allocation5 + $0x10] sm:$0xff]  ;;  %v236_v3 = vpack.c.bf16 %v48_v1, %v47_v0  ;;  %v50_v4 = vld [vmem:[#allocation5 + $0x18] sm:$0xff]  ;;  %v43_v6 = vld [vmem:[#allocation2] sm:$0xff]  ;;  %s164_s12 = sshll.u32 %s365_s11, 4  ;;  %s165_s12 = int_to_ptr.vmem [resolvable:$true] %s164_s12 }
  0x28   :  { %v240_v5 = vpack.c.bf16 %v50_v4, %v49_v2  ;;  %v45_v7 = vld [vmem:[#allocation2 + $0x10] sm:$0xff]  ;;  %v51_v8 = vld [vmem:[#allocation5 + $0x20] sm:$0xff]  ;;  %v52_v9 = vld [vmem:[#allocation5 + $0x28] sm:$0xff]  ;;  %230 = vmatprep.mubr.f32.mxu0 %v43_v6  ;;  %s333_s13 = scalar_lea.vmem %s165_s12, 512  ;;  %p338_p3 = scmp.lt.s32.totalorder %s165_s12, %s165_s12 }
  0x29   :  { %237 = vmatprep.subr.bf16.mxu0 %v236_v3  ;;  %268 = vmatprep.subr.bf16.mxu1 %v236_v3  ;;  %v244_v10 = vpack.c.bf16 %v52_v9, %v51_v8  ;;  %v53_v11 = vld [vmem:[#allocation5 + $0x30] sm:$0xff]  ;;  %v54_v12 = vld [vmem:[#allocation5 + $0x38] sm:$0xff]  ;;  %v55_v14 = vld [vmem:[#allocation5 + $0x40] sm:$0xff]  ;;  %p334_p2 = scmp.ne.s32.totalorder %s165_s12, %s333_s13  ;;  %p339_p4 = scmp.lt.s32.totalorder %s333_s13, %s333_s13 }
  0x2a   :  { %239 = vmatpush3.bf16.xpose.msra.mxu0 %v236_v3  ;;  %276 = vmatpush3.bf16.xpose.msra.mxu1 %v236_v3  ;;  %v248_v13 = vpack.c.bf16 %v54_v12, %v53_v11  ;;  %v56_v15 = vld [vmem:[#allocation5 + $0x48] sm:$0xff]  ;;  %v57_v17 = vld [vmem:[#allocation5 + $0x50] sm:$0xff]  ;;  %v58_v18 = vld [vmem:[#allocation5 + $0x58] sm:$0xff] }
  0x2b   :  { %241 = vmatprep.subr.bf16.mxu0 %v240_v5  ;;  %269 = vmatprep.subr.bf16.mxu1 %v240_v5  ;;  %v252_v16 = vpack.c.bf16 %v56_v15, %v55_v14  ;;  %v256_v19 = vpack.c.bf16 %v58_v18, %v57_v17  ;;  %v59_v20 = vld [vmem:[#allocation5 + $0x60] sm:$0xff]  ;;  %v60_v21 = vld [vmem:[#allocation5 + $0x68] sm:$0xff]  ;;  %v61_v23 = vld [vmem:[#allocation5 + $0x70] sm:$0xff]  ;;  %p340_p5 = por %p339_p4, %p338_p3 }
  0x2c   :  { %233 = vmatprep.mubr.f32.mxu1 %v45_v7  ;;  %v260_v22 = vpack.c.bf16 %v60_v21, %v59_v20  ;;  %v62_v24 = vld [vmem:[#allocation5 + $0x78] sm:$0xff]  ;;  %v44_v26 = vld [vmem:[#allocation2 + $0x8] sm:$0xff]  ;;  %v177_v28 = vld [vmem:[%s436_s2] ss:$0 sm:$0xff] }
  0x2d   :  { %v264_v25 = vpack.c.bf16 %v62_v24, %v61_v23  ;;  %v46_v27 = vld [vmem:[#allocation2 + $0x18] sm:$0xff]  ;;  %p341_p6 = pnand %p340_p5, %p334_p2 }
  0x32   :  { %243 = vmatpush3.bf16.xpose.msra.mxu0 %v240_v5  ;;  %277 = vmatpush3.bf16.xpose.msra.mxu1 %v240_v5 }
  0x33   :  { %245 = vmatprep.subr.bf16.mxu0 %v244_v10  ;;  %270 = vmatprep.subr.bf16.mxu1 %v244_v10 }
  0x3a   :  { %247 = vmatpush3.bf16.xpose.msra.mxu0 %v244_v10  ;;  %278 = vmatpush3.bf16.xpose.msra.mxu1 %v244_v10 }
  0x3b   :  { %249 = vmatprep.subr.bf16.mxu0 %v248_v13  ;;  %271 = vmatprep.subr.bf16.mxu1 %v248_v13 }
  0x42   :  { %251 = vmatpush3.bf16.xpose.msra.mxu0 %v248_v13  ;;  %279 = vmatpush3.bf16.xpose.msra.mxu1 %v248_v13 }
  0x43   :  { %253 = vmatprep.subr.bf16.mxu0 %v252_v16  ;;  %272 = vmatprep.subr.bf16.mxu1 %v252_v16 }
  0x4a   :  { %255 = vmatpush3.bf16.xpose.msra.mxu0 %v252_v16  ;;  %280 = vmatpush3.bf16.xpose.msra.mxu1 %v252_v16 }
  0x4b   :  { %257 = vmatprep.subr.bf16.mxu0 %v256_v19  ;;  %273 = vmatprep.subr.bf16.mxu1 %v256_v19 }
  0x52   :  { %259 = vmatpush3.bf16.xpose.msra.mxu0 %v256_v19  ;;  %281 = vmatpush3.bf16.xpose.msra.mxu1 %v256_v19 }
  0x53   :  { %261 = vmatprep.subr.bf16.mxu0 %v260_v22  ;;  %274 = vmatprep.subr.bf16.mxu1 %v260_v22 }
  0x5a   :  { %263 = vmatpush3.bf16.xpose.msra.mxu0 %v260_v22  ;;  %282 = vmatpush3.bf16.xpose.msra.mxu1 %v260_v22 }
  0x5b   :  { %265 = vmatprep.subr.bf16.mxu0 %v264_v25  ;;  %275 = vmatprep.subr.bf16.mxu1 %v264_v25 }
  0x62   :  { %267 = vmatpush3.bf16.xpose.msra.mxu0 %v264_v25  ;;  %283 = vmatpush3.bf16.xpose.msra.mxu1 %v264_v25 }
  0x69   :  { %231 = vmatmul.mubr.f32.vlgmr.msra.gmra.mrb[0].mxu0 %v44_v26  ;;  %234 = vmatmul.mubr.f32.vlgmr.msra.gmra.mrb[0].mxu1 %v46_v27 }
 0x13c   :  { %v232_v29 = vpop.f32.mrb[0].mxu0  ;;  %v235_v30 = vpop.f32.mrb[0].mxu1 }
 0x13d   :  { %v142_v31 = vadd.f32 %v232_v29, %v177_v28  ;;  %v152_v32 = vadd.f32 %v235_v30, %v177_v28  ;;  %v136_v33 = vpop.f32.mrb[1].mxu0  ;;  %v146_v34 = vpop.f32.mrb[1].mxu1 }
 0x13e   :  { %v137_v35 = vadd.f32 %v177_v28, %v136_v33  ;;  %v147_v36 = vadd.f32 %v177_v28, %v146_v34 }
 0x13f   :  { %156 = vst [vmem:[#allocation7 + $0x8] sm:$0xff] %v142_v31  ;;  %158 = vst [vmem:[#allocation7 + $0x18] sm:$0xff] %v152_v32 }
 0x140   :  { %155 = vst [vmem:[#allocation7] sm:$0xff] %v137_v35  ;;  %157 = vst [vmem:[#allocation7 + $0x10] sm:$0xff] %v147_v36 }
 0x141   :  { %344 = shalt.err (!%p341_p6)
}
 0x142   :  { %s345_s15 = scalar_lea.hbm %s437_s3, 512 }
 0x143   :  { %p346_p7 = scmp.ne.s32.totalorder %s437_s3, %s345_s15  ;;  %p349_p8 = scmp.lt.u32.totalorder %s345_s15, %s437_s3 }
 0x145   :  { %p351_p9 = pnand %p349_p8, %p346_p7 }
 0x147   :  { %354 = shalt.err (!%p351_p9)
}
 0x148   :  { %170 = dma.vmem_to_hbm [thread:$0]  %s165_s12, 512, %s437_s3, [#allocation4], %s362_s22, %s362_s22, %s363_s23  }
 0x149   :  { %359 = dma.done.wait [#allocation4], 512  }
 0x14a   :  { %360 = vsyncadd [#allocation4], 4294966784 }
 0x14b   :  { %174 = vsyncpa [#allocation3], 1 }
 0x14c   :  { %175 = vsyncpa [#allocation6], 1 }
 0x14d   :  { %176 = vsyncpa [#allocation4], 1 }

</bundles_post_ra>
